<compile_context>
chip_gen: v7x
topology: tpu7x:2x2x1
jax: 0.10.0
libtpu: 0.0.40
codegen_flags: <defaults>
</compile_context>

<pallas_src>
import functools

import jax
import jax.numpy as jnp
from jax.experimental import pallas as pl
from jax.experimental.pallas import tpu as pltpu

BN_EPS = 1e-5
LANE = 128


# ----------------------------- Pallas forward -------------------------------

@functools.partial(jax.jit, static_argnames=("n_l1", "n_l2", "n_out", "tm"))
def fnn_3l_forward(x, slab, *, n_l1, n_l2, n_out, tm=8192):
    """Fused eval-mode fnn_3l forward.

    x    : (N, F) float32 (same orientation as the PyTorch module).
    slab : packed parameter slab from fold_and_pack() (BN already folded).
    Returns (N, n_out) float32.
    """
    n, f = x.shape
    r, c = slab.shape  # r = n_l1 + n_l2 + n_out, bias lives in column c-1

    # 128-lane-aligned batch tile; one fat step for small batches, streamed
    # tiles for large ones (per-grid-step overhead ~0.35us, so go big).
    tm = pl.cdiv(tm, LANE) * LANE
    tm = max(LANE, min(tm, pl.cdiv(n, LANE) * LANE))
    n_pad = pl.cdiv(n, tm) * tm

    # Feature-major relayout (+ tail pad fused into the same copy).
    x_fm = jnp.pad(x.T.astype(jnp.float32), ((0, 0), (0, n_pad - n)))

    def kernel(x_ref, p_ref, o_ref):
        xt = x_ref[...]                                    # (F, TM) lane-dense

        # fc1: (Dropout=id) -> Linear -> ReLU          (BN1 folded into W2/b2)
        w1 = p_ref[0:n_l1, 0:f]                            # (n_l1, F)
        b1 = p_ref[0:n_l1, c - 1:c]                        # (n_l1, 1)
        h = jnp.dot(w1, xt, preferred_element_type=jnp.float32) + b1
        h = jnp.maximum(h, 0.0)                            # (n_l1, TM)

        # fc2: (Dropout=id) -> Linear(BN1-folded) -> ReLU (BN2 folded -> W3/b3)
        w2 = p_ref[n_l1:n_l1 + n_l2, 0:n_l1]               # (n_l2, n_l1)
        b2 = p_ref[n_l1:n_l1 + n_l2, c - 1:c]              # (n_l2, 1)
        h = jnp.dot(w2, h, preferred_element_type=jnp.float32) + b2
        h = jnp.maximum(h, 0.0)                            # (n_l2, TM)

        # fc3: (Dropout=id) -> Linear(BN2-folded)
        w3 = p_ref[n_l1 + n_l2:r, 0:n_l2]                  # (n_out, n_l2)
        b3 = p_ref[n_l1 + n_l2:r, c - 1:c]                 # (n_out, 1)
        out = jnp.dot(w3, h, preferred_element_type=jnp.float32) + b3
        o_ref[...] = out.astype(o_ref.dtype)               # lane-dense store

    out_fm = pl.pallas_call(
        kernel,
        out_shape=jax.ShapeDtypeStruct((n_out, n_pad), jnp.float32),
        grid=(n_pad // tm,),
        in_specs=[
            # x streams over the batch (lane) axis.
            pl.BlockSpec((f, tm), lambda i: (0, i)),
            # Single parameter slab: full-extent block, constant index_map ->
            # one HBM->VMEM DMA, VMEM-resident for the whole grid.
            pl.BlockSpec((r, c), lambda i: (0, 0)),
        ],
        out_specs=pl.BlockSpec((n_out, tm), lambda i: (0, i)),
        compiler_params=pltpu.CompilerParams(
            dimension_semantics=("parallel",)),
    )(x_fm, slab)

    return out_fm[:, :n].T


# --------------------- BN folding + parameter packing -----------------------

def fold_and_pack(params):
    """Fold eval-mode BN (applied after ReLU) into the next Linear and pack
    everything into one lane-dense slab:
        rows [0, n_l1)          : W1        | b1  in the last column
        rows [n_l1, n_l1+n_l2)  : W2_folded | b2_folded
        rows [n_l1+n_l2, end)   : W3_folded | b3_folded
    Weights are (out, in) (PyTorch convention)."""
    (w1, b1, g1, be1, m1, v1,
     w2, b2, g2, be2, m2, v2,
     w3, b3) = params
    n_l1, f = w1.shape
    n_l2 = w2.shape[0]
    n_out = w3.shape[0]

    # y = W @ (s*h + t) + b == (W * s[None,:]) @ h + (W @ t + b)
    s1 = g1 * jax.lax.rsqrt(v1 + BN_EPS)
    t1 = be1 - m1 * s1
    s2 = g2 * jax.lax.rsqrt(v2 + BN_EPS)
    t2 = be2 - m2 * s2
    w2f = w2 * s1[None, :]
    b2f = b2 + w2 @ t1
    w3f = w3 * s2[None, :]
    b3f = b3 + w3 @ t2

    r = n_l1 + n_l2 + n_out
    c = max(f, n_l1, n_l2) + 1
    slab = jnp.zeros((r, c), jnp.float32)
    slab = slab.at[0:n_l1, 0:f].set(w1)
    slab = slab.at[0:n_l1, c - 1].set(b1)
    slab = slab.at[n_l1:n_l1 + n_l2, 0:n_l1].set(w2f)
    slab = slab.at[n_l1:n_l1 + n_l2, c - 1].set(b2f)
    slab = slab.at[n_l1 + n_l2:r, 0:n_l2].set(w3f)
    slab = slab.at[n_l1 + n_l2:r, c - 1].set(b3f)
    return slab, (f, n_l1, n_l2, n_out)


# ----------------------------- init & reference -----------------------------

def xavier_uniform(key, fan_out, fan_in):
    # torch.nn.init.xavier_uniform_ for a (fan_out, fan_in) Linear weight.
    bound = (6.0 / (fan_in + fan_out)) ** 0.5
    return jax.random.uniform(key, (fan_out, fan_in), jnp.float32, -bound, bound)


def linear_bias(key, fan_in, fan_out):
    # PyTorch default Linear bias init: U(-1/sqrt(fan_in), 1/sqrt(fan_in)).
    bound = 1.0 / (fan_in ** 0.5)
    return jax.random.uniform(key, (fan_out,), jnp.float32, -bound, bound)


def init_params(key, input_size, n_l1, n_l2, for_sex=False):
    n_out = 2 if for_sex else 1
    k = jax.random.split(key, 12)
    w1 = xavier_uniform(k[0], n_l1, input_size)
    b1 = linear_bias(k[1], input_size, n_l1)
    w2 = xavier_uniform(k[2], n_l2, n_l1)
    b2 = linear_bias(k[3], n_l1, n_l2)
    w3 = xavier_uniform(k[4], n_out, n_l2)
    b3 = linear_bias(k[5], n_l2, n_out)

    # BatchNorm1d eval-mode state.  Fresh PyTorch init is weight=1, bias=0,
    # mean=0, var=1; perturbed deterministically so the BN-folding path is
    # exercised non-trivially.
    g1 = 1.0 + 0.1 * jax.random.normal(k[6], (n_l1,), jnp.float32)
    be1 = 0.1 * jax.random.normal(k[7], (n_l1,), jnp.float32)
    m1 = 0.1 * jax.random.normal(k[8], (n_l1,), jnp.float32)
    v1 = jax.random.uniform(k[9], (n_l1,), jnp.float32, 0.5, 1.5)
    g2 = 1.0 + 0.1 * jax.random.normal(k[10], (n_l2,), jnp.float32)
    be2 = 0.1 * jax.random.normal(k[11], (n_l2,), jnp.float32)
    m2 = jnp.zeros((n_l2,), jnp.float32)
    v2 = jnp.ones((n_l2,), jnp.float32)

    return (w1, b1, g1, be1, m1, v1,
            w2, b2, g2, be2, m2, v2,
            w3, b3)


def reference_forward(x, params):
    """Pure-JAX reference of the eval-mode forward with explicit (unfolded) BN."""
    (w1, b1, g1, be1, m1, v1,
     w2, b2, g2, be2, m2, v2,
     w3, b3) = params
    h = jnp.maximum(x @ w1.T + b1, 0.0)
    h = (h - m1) * jax.lax.rsqrt(v1 + BN_EPS) * g1 + be1
    h = jnp.maximum(h @ w2.T + b2, 0.0)
    h = (h - m2) * jax.lax.rsqrt(v2 + BN_EPS) * g2 + be2
    return h @ w3.T + b3


if __name__ == "__main__":
    key = jax.random.PRNGKey(0)
    k_x, k_x2, k_p = jax.random.split(key, 3)

    input_size = 16
    n_l1 = 32
    n_l2 = 16
    for_sex = False
    n_out = 2 if for_sex else 1

    params = init_params(k_p, input_size, n_l1, n_l2, for_sex=for_sex)
    slab, _ = fold_and_pack(params)

    # Tolerance note: MXU default precision rounds f32 operands to bf16 (with
    # f32 accumulation) in both the kernel and the jnp reference, so 1e-3 is
    # the honest agreement level vs an unfolded-BN reference.

    # Case 1: tiny unaligned batch (single fat grid step, tail padding path).
    batch = 10
    x = jax.random.normal(k_x, (batch, input_size), jnp.float32)
    out = fnn_3l_forward(x, slab, n_l1=n_l1, n_l2=n_l2, n_out=n_out)
    out = jax.block_until_ready(out)
    ref = reference_forward(x, params)
    assert out.shape == (batch, n_out), out.shape
    assert jnp.allclose(out, ref, atol=1e-3, rtol=1e-3), "mismatch vs reference (case 1)"

    # Case 2: larger unaligned batch with a forced multi-step grid to exercise
    # the streaming/pipelined path (tm=128 -> grid of 3 steps).
    batch2 = 300
    x2 = jax.random.normal(k_x2, (batch2, input_size), jnp.float32)
    out2 = fnn_3l_forward(x2, slab, n_l1=n_l1, n_l2=n_l2, n_out=n_out, tm=128)
    out2 = jax.block_until_ready(out2)
    ref2 = reference_forward(x2, params)
    assert out2.shape == (batch2, n_out), out2.shape
    assert jnp.allclose(out2, ref2, atol=1e-3, rtol=1e-3), "mismatch vs reference (case 2)"

    print("KERNEL_OK")
</pallas_src>

<mosaic_0001>
module attributes {stable_mosaic.version = 11 : i64} {
  func.func @kernel(%arg0: i32, %arg1: memref<16x128xf32, #tpu.memory_space<vmem>>, %arg2: memref<49x33xf32, #tpu.memory_space<vmem>>, %arg3: memref<1x128xf32, #tpu.memory_space<vmem>>) attributes {dimension_semantics = [#tpu.dimension_semantics<parallel>], iteration_bounds = array<i64: 1>, scalar_prefetch = 0 : i64, scratch_operands = 0 : i64, tpu.core_type = #tpu.core_type<tc>, window_params = [{transform_indices = @transform_0, window_bounds = array<i64: 16, 128>}, {pipeline_mode = #tpu.pipeline_mode<synchronous>, transform_indices = @transform_1, window_bounds = array<i64: 49, 33>}, {transform_indices = @transform_2, window_bounds = array<i64: 1, 128>}]} {
    %c0 = arith.constant 0 : index
    %c0_0 = arith.constant 0 : index
    %0 = vector.load %arg1[%c0, %c0_0] : memref<16x128xf32, #tpu.memory_space<vmem>>, vector<16x128xf32>
    %c0_1 = arith.constant 0 : index
    %c0_2 = arith.constant 0 : index
    %1 = vector.load %arg2[%c0_1, %c0_2] : memref<49x33xf32, #tpu.memory_space<vmem>>, vector<32x16xf32>
    %c0_3 = arith.constant 0 : index
    %c32 = arith.constant 32 : index
    %2 = vector.load %arg2[%c0_3, %c32] : memref<49x33xf32, #tpu.memory_space<vmem>>, vector<32x1xf32>
    %cst = arith.constant dense<0.000000e+00> : vector<32x128xf32>
    %3 = tpu.matmul %1, %0, %cst {dimension_numbers = #tpu.dot_dimension_numbers<[1], [0], [0], [1], [0, 0, 1, 1], [], []>} : vector<32x16xf32>, vector<16x128xf32>, vector<32x128xf32> -> vector<32x128xf32>
    %4 = vector.broadcast %2 : vector<32x1xf32> to vector<32x128xf32>
    %5 = arith.addf %3, %4 : vector<32x128xf32>
    %cst_4 = arith.constant 0.000000e+00 : f32
    %6 = vector.broadcast %cst_4 : f32 to vector<32x128xf32>
    %7 = arith.maximumf %5, %6 : vector<32x128xf32>
    %c32_5 = arith.constant 32 : index
    %c0_6 = arith.constant 0 : index
    %8 = vector.load %arg2[%c32_5, %c0_6] : memref<49x33xf32, #tpu.memory_space<vmem>>, vector<16x32xf32>
    %c32_7 = arith.constant 32 : index
    %c32_8 = arith.constant 32 : index
    %9 = vector.load %arg2[%c32_7, %c32_8] : memref<49x33xf32, #tpu.memory_space<vmem>>, vector<16x1xf32>
    %cst_9 = arith.constant dense<0.000000e+00> : vector<16x128xf32>
    %10 = tpu.matmul %8, %7, %cst_9 {dimension_numbers = #tpu.dot_dimension_numbers<[1], [0], [0], [1], [0, 0, 1, 1], [], []>} : vector<16x32xf32>, vector<32x128xf32>, vector<16x128xf32> -> vector<16x128xf32>
    %11 = vector.broadcast %9 : vector<16x1xf32> to vector<16x128xf32>
    %12 = arith.addf %10, %11 : vector<16x128xf32>
    %cst_10 = arith.constant 0.000000e+00 : f32
    %13 = vector.broadcast %cst_10 : f32 to vector<16x128xf32>
    %14 = arith.maximumf %12, %13 : vector<16x128xf32>
    %c48 = arith.constant 48 : index
    %c0_11 = arith.constant 0 : index
    %15 = vector.load %arg2[%c48, %c0_11] : memref<49x33xf32, #tpu.memory_space<vmem>>, vector<1x16xf32>
    %c48_12 = arith.constant 48 : index
    %c32_13 = arith.constant 32 : index
    %16 = vector.load %arg2[%c48_12, %c32_13] : memref<49x33xf32, #tpu.memory_space<vmem>>, vector<1x1xf32>
    %cst_14 = arith.constant dense<0.000000e+00> : vector<1x128xf32>
    %17 = tpu.matmul %15, %14, %cst_14 {dimension_numbers = #tpu.dot_dimension_numbers<[1], [0], [0], [1], [0, 0, 1, 1], [], []>} : vector<1x16xf32>, vector<16x128xf32>, vector<1x128xf32> -> vector<1x128xf32>
    %18 = vector.broadcast %16 : vector<1x1xf32> to vector<1x128xf32>
    %19 = arith.addf %17, %18 : vector<1x128xf32>
    %c0_15 = arith.constant 0 : index
    %c0_16 = arith.constant 0 : index
    %20 = vector.load %arg3[%c0_15, %c0_16] : memref<1x128xf32, #tpu.memory_space<vmem>>, vector<1x128xf32>
    tpu.vector_store %arg3[%c0_15, %c0_16], %19 {strides = array<i32>} : memref<1x128xf32, #tpu.memory_space<vmem>>, vector<1x128xf32>,
    return
  }
  func.func @transform_0(%arg0: i32) -> (i32, i32) {
    %c0_i32 = arith.constant 0 : i32
    %c0_i32_0 = arith.constant 0 : i32
    return %c0_i32, %arg0 : i32, i32
  }
  func.func @transform_1(%arg0: i32) -> (i32, i32) {
    %c0_i32 = arith.constant 0 : i32
    %c0_i32_0 = arith.constant 0 : i32
    %c0_i32_1 = arith.constant 0 : i32
    return %c0_i32, %c0_i32_0 : i32, i32
  }
  func.func @transform_2(%arg0: i32) -> (i32, i32) {
    %c0_i32 = arith.constant 0 : i32
    %c0_i32_0 = arith.constant 0 : i32
    return %c0_i32, %arg0 : i32, i32
  }
}

</mosaic_0001>

<bundles_post_ra>
// kernel: fnn_3l_forward.1
= control target key start
LH: loop header
LB: loop body
LE: loop exit
PB: predicated region body
PF: predicated region fallthrough
CT: control target
= control target key end

     0   :  { %vm37_vm0 = vcmask 130048   ;;  %v383_v3 = vmov 32   ;;  %vm147_vm1 = vcmask 261120   ;;  %v384_v29 = vmov 0.0|0.0   ;;  %s439_s0 = inlined_call_operand.vmem [shape: f32[16,128], index: 0, kind: input, shape index: {}]   ;;  %s440_s1 = inlined_call_operand.vmem [shape: f32[49,33], index: 1, kind: input, shape index: {}]   ;;  %s441_s2 = inlined_call_operand.vmem [shape: f32[1,128], index: 2, kind: output, shape index: {}]  }
   0x1   :  { %v11_v0 = vld [vmem:[%s439_s0] sm:$0xff]  ;;  %v12_v1 = vld [vmem:[%s439_s0 + $0x8] sm:$0xff]  ;;  %381 = vset.pattern.permute.xlu0 %v383_v3  ;;  %382 = vset.pattern.permute.xlu1 %v383_v3  ;;  %v15_v5 = vld [vmem:[%s440_s1 + $0x10] sm:$0xff]  ;;  %vm385_vm2 = vmmov 0   ;;  %v386_v30 = vmov 0.0  }
   0x2   :  { %v13_v2 = vld [vmem:[%s440_s1] sm:$0xff]  ;;  %v362_v4 = vpack.c.bf16 %v12_v1, %v11_v0  ;;  %29 = vperm.xlu1 %382, %v15_v5   ;;  %v14_v6 = vld [vmem:[%s440_s1 + $0x8] sm:$0xff]  ;;  %v16_v7 = vld [vmem:[%s440_s1 + $0x18] sm:$0xff] }
   0x3   :  { %338 = vmatprep.mubr.msk.f32.mxu0 %vm37_vm0, %v13_v2  ;;  %19 = vperm.xlu0 %381, %v13_v2   ;;  %v135_v8 = vld [vmem:[%s440_s1 + $0x20] sm:$0xff]  ;;  %v136_v9 = vld [vmem:[%s440_s1 + $0x28] sm:$0xff]  ;;  %v229_v10 = vld [vmem:[%s440_s1 + $0x30] sm:$0x1] }
   0x4   :  { %363 = vmatprep.subr.bf16.mxu0 %v362_v4  ;;  %352 = vmatprep.mubr.msk.f32.mxu1 %vm147_vm1, %v135_v8 }
   0x5   :  { %365 = vmatpush3.bf16.msra.mxu0 %v362_v4 }
   0x6   :  { %34 = vperm.xlu1 %382, %v16_v7   ;;  %374 = vmatprep.subr.bf16.mxu0 %v384_v29 }
   0x7   :  { %24 = vperm.xlu0 %381, %v14_v6  }
   0x8   :  { %339 = vmatmul.mubr.msk.f32.vlgmr.msra.gmra.mrb[0].mxu0 %vm37_vm0, %v14_v6 }
   0x9   :  { %341 = vmatprep.mubr.msk.f32.mxu0 %vm37_vm0, %v15_v5 }
   0xa   :  { %144 = vperm.xlu1 %382, %v136_v9  }
   0xb   :  { %139 = vperm.xlu0 %381, %v135_v8  }
   0xc   :  { %342 = vmatmul.mubr.msk.f32.gmra.mrb[2].mxu0 %vm37_vm0, %v16_v7 }
   0xd   :  { %359 = vmatprep.mubr.msk.f32.mxu0 %vm385_vm2, %v386_v30 }
   0xf   :  { %232 = vperm.xlu0 %381, %v229_v10  }
  0x81   :  { %v30_v12 = vpop.permute.xlu1 %29 }
  0x82   :  { %v20_v11 = vpop.permute.xlu0 %19 }
  0x85   :  { %v35_v19 = vpop.permute.xlu1 %34 }
  0x86   :  { %v25_v13 = vpop.permute.xlu0 %24 }
  0x89   :  { %v145_v31 = vpop.permute.xlu1 %144 }
  0x8a   :  { %v140_v33 = vpop.permute.xlu0 %139 }
  0x8e   :  { %v233_v40 = vpop.permute.xlu0 %232 }
  0xdb   :  { %v340_v14 = vpop.f32.mrb[0].mxu0 }
  0xdc   :  { %v118_v15 = vadd.f32 %v340_v14, %v25_v13  ;;  %v112_v16 = vpop.f32.mrb[1].mxu0 }
  0xdd   :  { %v113_v17 = vadd.f32 %v112_v16, %v20_v11 }
  0xde   :  { %v132_v18 = vmax.f32 %v118_v15, 0.0 }
  0xdf   :  { %v131_v20 = vmax.f32 %v113_v17, 0.0  ;;  %v343_v21 = vpop.f32.mrb[2].mxu0 }
  0xe0   :  { %v128_v22 = vadd.f32 %v343_v21, %v35_v19  ;;  %v122_v23 = vpop.f32.mrb[3].mxu0 }
  0xe1   :  { %v123_v24 = vadd.f32 %v122_v23, %v30_v12  ;;  %v366_v25 = vpack.c.bf16 %v132_v18, %v131_v20 }
  0xe2   :  { %v134_v26 = vmax.f32 %v128_v22, 0.0 }
  0xe3   :  { %v133_v27 = vmax.f32 %v123_v24, 0.0  ;;  %367 = vmatprep.subr.bf16.mxu1 %v366_v25 }
  0xe4   :  { %369 = vmatpush3.bf16.msra.mxu1 %v366_v25 }
  0xe5   :  { %v370_v28 = vpack.c.bf16 %v134_v26, %v133_v27 }
  0xe7   :  { %371 = vmatprep.subr.bf16.mxu1 %v370_v28 }
  0xe8   :  { %373 = vmatpush3.bf16.msra.mxu1 %v370_v28 }
  0xeb   :  { %353 = vmatmul.mubr.msk.f32.vlgmr.msra.gmra.mrb[0].mxu1 %vm147_vm1, %v136_v9 }
 0x1be   :  { %v354_v32 = vpop.f32.mrb[0].mxu1 }
 0x1bf   :  { %v224_v34 = vadd.f32 %v354_v32, %v145_v31  ;;  %v218_v35 = vpop.f32.mrb[1].mxu1 }
 0x1c0   :  { %v219_v36 = vadd.f32 %v218_v35, %v140_v33 }
 0x1c1   :  { %v228_v37 = vmax.f32 %v224_v34, 0.0 }
 0x1c2   :  { %v227_v38 = vmax.f32 %v219_v36, 0.0 }
 0x1c4   :  { %v375_v39 = vpack.c.bf16 %v228_v37, %v227_v38 }
 0x1c6   :  { %376 = vmatpush3.bf16.msra.mxu0 %v375_v39 }
 0x1c9   :  { %360 = vmatmul.mubr.msk.f32.vlgmr.msra.gmra.mrb[4].mxu0 %vm37_vm0, %v229_v10 }
 0x29c   :  { %v303_v41 = vpop.f32.mrb[4].mxu0 }
 0x29d   :  { %v304_v42 = vadd.f32 %v303_v41, %v233_v40  ;;  %v361_v43 = vpop.f32.mrb[5].mxu0 }
 0x29f   :  { %307 = vst [vmem:[%s441_s2] sm:$0x1] %v304_v42 }

</bundles_post_ra>
